<compile_context>
chip_gen: v5e
topology: v5e:2x2
jax: 0.10.0
libtpu: 0.0.40
codegen_flags: <defaults>
</compile_context>

<pallas_src>
import functools

import jax
import jax.numpy as jnp
from jax import lax
from jax.experimental import pallas as pl
from jax.experimental.pallas import tpu as pltpu


# ----------------------------------------------------------------------------
# helpers
# ----------------------------------------------------------------------------
def _round_up(x, m):
    return ((x + m - 1) // m) * m


def _pick_tile(dim, align, target):
    """Smallest aligned size covering `dim`, capped at `target`."""
    aligned = _round_up(dim, align)
    return aligned if aligned <= target else target


def _pad2d(a, rows, cols):
    r, c = a.shape
    if r == rows and c == cols:
        return a
    return jnp.pad(a, ((0, rows - r), (0, cols - c)))


def _apply_act(acc, activation):
    if activation == "relu":
        return jnp.maximum(acc, 0.0)
    if activation == "sigmoid":
        return jax.nn.sigmoid(acc)
    return acc


def _fused_padded_param_bytes(params, num_features):
    """VMEM footprint of the fused path (weights padded to 128-lane widths)."""
    total = 0
    prev_in = num_features
    for (w, b) in params:
        dout_p = _round_up(w.shape[0], 128)
        total += dout_p * prev_in * 4 + dout_p * 4
        prev_in = dout_p
    return total


# Padded-parameter budget below which the whole MLP is fused into one kernel
# (conservative: leaves room for double-buffered x/out tiles + intermediates
# within the 32 MiB scoped-VMEM default, valid on v5e/v6e/v7x).
_FUSED_PARAM_BYTES_BUDGET = 6 * 1024 * 1024


# ----------------------------------------------------------------------------
# Kernel 1: fully fused small MLP (all weights resident in VMEM)
# ----------------------------------------------------------------------------
def _fused_mlp_kernel(*refs, activations):
    x_ref = refs[0]
    o_ref = refs[-1]
    wb_refs = refs[1:-1]                       # (w0, b0, w1, b1, ...)

    h = x_ref[...]
    n_layers = len(activations)
    for i, act in enumerate(activations):
        w = wb_refs[2 * i][...]                # native (Dout_pad, Din) layout
        b = wb_refs[2 * i + 1][...]            # (1, Dout_pad), f32
        acc = lax.dot_general(
            h, w,
            dimension_numbers=(((1,), (1,)), ((), ())),   # x @ w.T on the MXU
            preferred_element_type=jnp.float32)
        acc = _apply_act(acc + b, act)
        if i + 1 < n_layers:
            h = acc.astype(x_ref.dtype)        # keep compute dtype for next MXU
        else:
            o_ref[...] = acc.astype(o_ref.dtype)


def mlp_fused_forward(x, params, activations, compute_dtype=jnp.float32,
                      tm_target=512):
    """Run the whole MLP in a single pallas_call (weights fit in VMEM)."""
    B, Din = x.shape
    Dcls = params[-1][0].shape[0]

    # Pad every layer's output width to a multiple of 128: lane-dense
    # intermediates, unmasked full-lane output stores.  Semantics preserved
    # (zero-padded weights/bias, relu(0)=0, padded input columns of the next
    # weight are zero, padded sigmoid columns sliced off below).
    out_dims = [w.shape[0] for (w, _) in params]
    out_dims_p = [_round_up(d, 128) for d in out_dims]
    in_dims_p = [Din] + out_dims_p[:-1]
    Dcls_p = out_dims_p[-1]

    tm = _pick_tile(B, 8, tm_target)
    Bp = _round_up(B, tm)
    xp = _pad2d(x, Bp, Din).astype(compute_dtype)

    args = [xp]
    in_specs = [pl.BlockSpec((tm, Din), lambda i: (i, 0))]
    for li, (w, bvec) in enumerate(params):
        dop, dip = out_dims_p[li], in_dims_p[li]
        args.append(_pad2d(w, dop, dip).astype(compute_dtype))
        args.append(_pad2d(bvec.reshape(1, -1), 1, dop).astype(jnp.float32))
        in_specs.append(pl.BlockSpec((dop, dip), lambda i: (0, 0)))   # resident
        in_specs.append(pl.BlockSpec((1, dop), lambda i: (0, 0)))     # resident

    kernel = functools.partial(_fused_mlp_kernel,
                               activations=tuple(activations))

    flops = sum(2 * B * w.shape[1] * w.shape[0] for (w, _) in params)
    transc = B * Dcls if activations[-1] == "sigmoid" else 0
    bytes_accessed = sum(int(a.size) * a.dtype.itemsize for a in args) \
        + Bp * Dcls_p * 4

    out = pl.pallas_call(
        kernel,
        out_shape=jax.ShapeDtypeStruct((Bp, Dcls_p), jnp.float32),
        grid_spec=pltpu.PrefetchScalarGridSpec(
            num_scalar_prefetch=0,
            grid=(Bp // tm,),
            in_specs=in_specs,
            out_specs=pl.BlockSpec((tm, Dcls_p), lambda i: (i, 0)),
        ),
        compiler_params=pltpu.CompilerParams(
            dimension_semantics=("parallel",),          # split batch across TCs
            vmem_limit_bytes=32 * 1024 * 1024,
        ),
        cost_estimate=pl.CostEstimate(
            flops=flops, transcendentals=transc,
            bytes_accessed=bytes_accessed),
    )(*args)

    return out[:B, :Dcls]


# ----------------------------------------------------------------------------
# Kernel 2: general tiled Linear (+ fused activation), (M, N, K) grid
# ----------------------------------------------------------------------------
def _linear_tiled_kernel(x_ref, w_ref, b_ref, o_ref, acc_ref, *, activation):
    k = pl.program_id(2)

    @pl.when(k == 0)
    def _():
        acc_ref[...] = jnp.zeros_like(acc_ref)

    # x:[tm,tk], w:[tn,tk] (native layout) -> contract over K on the MXU.
    acc_ref[...] += lax.dot_general(
        x_ref[...], w_ref[...],
        dimension_numbers=(((1,), (1,)), ((), ())),
        preferred_element_type=jnp.float32)

    @pl.when(k == pl.num_programs(2) - 1)
    def _():
        # bias + activation only once, in the epilogue (pure MXU inner loop).
        acc = _apply_act(acc_ref[...] + b_ref[...], activation)
        o_ref[...] = acc.astype(o_ref.dtype)


def linear_forward(x, w, b, activation="none", compute_dtype=jnp.float32,
                   tm_target=256, tn_target=512, tk_target=512):
    """x:[B,Din], w:[Dout,Din] (PyTorch layout), b:[Dout] -> [B,Dout] f32."""
    B, Din = x.shape
    Dout = w.shape[0]

    tm = _pick_tile(B, 8, tm_target)
    tk = _pick_tile(Din, 128, tk_target)
    tn = _pick_tile(Dout, 128, tn_target)

    Bp, Kp, Np = _round_up(B, tm), _round_up(Din, tk), _round_up(Dout, tn)

    xp = _pad2d(x, Bp, Kp).astype(compute_dtype)
    wp = _pad2d(w, Np, Kp).astype(compute_dtype)     # no transpose: native layout
    bp = _pad2d(b.reshape(1, Dout), 1, Np).astype(jnp.float32)

    grid = (Bp // tm, Np // tn, Kp // tk)
    kernel = functools.partial(_linear_tiled_kernel, activation=activation)

    flops = 2 * B * Din * Dout
    transc = B * Dout if activation == "sigmoid" else 0
    bytes_accessed = (int(xp.size) * xp.dtype.itemsize
                      + int(wp.size) * wp.dtype.itemsize
                      + int(bp.size) * 4 + Bp * Np * 4)

    out = pl.pallas_call(
        kernel,
        out_shape=jax.ShapeDtypeStruct((Bp, Np), jnp.float32),
        grid_spec=pltpu.PrefetchScalarGridSpec(
            num_scalar_prefetch=0,
            grid=grid,
            in_specs=[
                pl.BlockSpec((tm, tk), lambda i, j, k: (i, k)),
                pl.BlockSpec((tn, tk), lambda i, j, k: (j, k)),
                pl.BlockSpec((1, tn), lambda i, j, k: (0, j)),
            ],
            out_specs=pl.BlockSpec((tm, tn), lambda i, j, k: (i, j)),
            scratch_shapes=[pltpu.VMEM((tm, tn), jnp.float32)],
        ),
        compiler_params=pltpu.CompilerParams(
            dimension_semantics=("parallel", "parallel", "arbitrary"),
            vmem_limit_bytes=32 * 1024 * 1024,
        ),
        cost_estimate=pl.CostEstimate(
            flops=flops, transcendentals=transc,
            bytes_accessed=bytes_accessed),
    )(xp, wp, bp)

    return out[:B, :Dout]


# ----------------------------------------------------------------------------
# Module wrapper
# ----------------------------------------------------------------------------
class MLPPallas:
    """JAX/Pallas mirror of the PyTorch MLP module's forward pass."""

    def __init__(self, num_features, layer_depths, num_classes,
                 add_sigmoid=False, key=None, compute_dtype=jnp.float32):
        if add_sigmoid and num_classes != 1:
            raise ValueError("Only single-class classification with sigmoid.")
        self.add_sigmoid = add_sigmoid
        self.num_features = num_features
        self.compute_dtype = compute_dtype
        if key is None:
            key = jax.random.PRNGKey(0)

        dims = []
        if len(layer_depths) > 0:
            dims.append((num_features, layer_depths[0]))
            for i in range(1, len(layer_depths)):
                dims.append((layer_depths[i - 1], layer_depths[i]))
            dims.append((layer_depths[-1], num_classes))
        else:
            dims.append((num_features, num_classes))

        # Deterministic init, PyTorch-Linear-style U(-1/sqrt(fan_in), +).
        self.params = []
        for (fan_in, fan_out) in dims:
            key, kw, kb = jax.random.split(key, 3)
            bound = 1.0 / jnp.sqrt(jnp.asarray(fan_in, jnp.float32))
            w = jax.random.uniform(kw, (fan_out, fan_in), jnp.float32,
                                   -bound, bound)
            b = jax.random.uniform(kb, (fan_out,), jnp.float32, -bound, bound)
            self.params.append((w, b))

        # jit the functional forward so wrapper-side pad/cast/slice plumbing
        # fuses with the surrounding XLA graph instead of running as separate
        # eager ops around the pallas_call.
        self._forward = jax.jit(self._forward_impl)

    def _activations(self):
        n = len(self.params)
        acts = []
        for i in range(n):
            if i < n - 1:
                acts.append("relu")
            elif self.add_sigmoid:
                acts.append("sigmoid")
            else:
                acts.append("none")
        return acts

    def _forward_impl(self, x):
        acts = self._activations()
        padded_bytes = _fused_padded_param_bytes(self.params,
                                                 self.num_features)
        if padded_bytes <= _FUSED_PARAM_BYTES_BUDGET:
            # Whole MLP in one kernel: no per-layer launches, no HBM round-trip
            # for intermediate activations.
            return mlp_fused_forward(x, self.params, acts,
                                     compute_dtype=self.compute_dtype)
        # Large layers: per-layer tiled Linear+activation kernels.
        out = x
        for (w, b), act in zip(self.params, acts):
            out = linear_forward(out, w, b, activation=act,
                                 compute_dtype=self.compute_dtype)
        return out

    def __call__(self, x):
        return self._forward(x)


# ----------------------------------------------------------------------------
# self-test
# ----------------------------------------------------------------------------
if __name__ == "__main__":
    key = jax.random.PRNGKey(0)
    key, kx = jax.random.split(key)

    batch = 2
    num_features = 16
    layer_depths = [32, 32]
    num_classes = 1
    add_sigmoid = True

    x = jax.random.normal(kx, (batch, num_features), jnp.float32)
    model = MLPPallas(num_features, layer_depths, num_classes,
                      add_sigmoid=add_sigmoid, key=key)
    out = jax.block_until_ready(model(x))

    # Pure-JAX reference (f32, highest precision matmul).
    ref = x
    n = len(model.params)
    for i, (w, b) in enumerate(model.params):
        ref = jnp.matmul(ref, w.T, precision=lax.Precision.HIGHEST) + b
        if i != n - 1:
            ref = jnp.maximum(ref, 0.0)
        elif add_sigmoid:
            ref = jax.nn.sigmoid(ref)
    assert out.shape == (batch, num_classes)
    assert jnp.allclose(out, ref, atol=1e-4, rtol=1e-4)

    # Also exercise the general tiled (M, N, K) path at non-aligned sizes
    # (padding + K-reduction accumulator + fused epilogue).
    key, kx2, kw2, kb2 = jax.random.split(key, 4)
    B2, Din2, Dout2 = 300, 700, 600
    x2 = jax.random.normal(kx2, (B2, Din2), jnp.float32)
    w2 = jax.random.normal(kw2, (Dout2, Din2), jnp.float32) * 0.05
    b2 = jax.random.normal(kb2, (Dout2,), jnp.float32)
    y2 = jax.block_until_ready(linear_forward(x2, w2, b2, activation="relu"))
    ref2 = jnp.maximum(
        jnp.matmul(x2, w2.T, precision=lax.Precision.HIGHEST) + b2, 0.0)
    assert y2.shape == (B2, Dout2)
    assert jnp.allclose(y2, ref2, atol=5e-3, rtol=5e-3)

    # No-hidden-layer edge case (single Linear, no activation).
    model0 = MLPPallas(num_features, [], 3, add_sigmoid=False, key=key)
    out0 = jax.block_until_ready(model0(x))
    w0, b0 = model0.params[0]
    ref0 = jnp.matmul(x, w0.T, precision=lax.Precision.HIGHEST) + b0
    assert out0.shape == (batch, 3)
    assert jnp.allclose(out0, ref0, atol=1e-4, rtol=1e-4)

    print("KERNEL_OK")
</pallas_src>

<mosaic_0001>
module attributes {stable_mosaic.version = 11 : i64} {
  func.func @_fused_mlp_kernel(%arg0: i32, %arg1: memref<8x16xf32, #tpu.memory_space<vmem>>, %arg2: memref<128x16xf32, #tpu.memory_space<vmem>>, %arg3: memref<1x128xf32, #tpu.memory_space<vmem>>, %arg4: memref<128x128xf32, #tpu.memory_space<vmem>>, %arg5: memref<1x128xf32, #tpu.memory_space<vmem>>, %arg6: memref<128x128xf32, #tpu.memory_space<vmem>>, %arg7: memref<1x128xf32, #tpu.memory_space<vmem>>, %arg8: memref<8x128xf32, #tpu.memory_space<vmem>>) attributes {dimension_semantics = [#tpu.dimension_semantics<parallel>], iteration_bounds = array<i64: 1>, scalar_prefetch = 0 : i64, scratch_operands = 0 : i64, tpu.core_type = #tpu.core_type<tc>, window_params = [{transform_indices = @transform_0, window_bounds = array<i64: 8, 16>}, {pipeline_mode = #tpu.pipeline_mode<synchronous>, transform_indices = @transform_1, window_bounds = array<i64: 128, 16>}, {pipeline_mode = #tpu.pipeline_mode<synchronous>, transform_indices = @transform_2, window_bounds = array<i64: 1, 128>}, {pipeline_mode = #tpu.pipeline_mode<synchronous>, transform_indices = @transform_3, window_bounds = array<i64: 128, 128>}, {pipeline_mode = #tpu.pipeline_mode<synchronous>, transform_indices = @transform_4, window_bounds = array<i64: 1, 128>}, {pipeline_mode = #tpu.pipeline_mode<synchronous>, transform_indices = @transform_5, window_bounds = array<i64: 128, 128>}, {pipeline_mode = #tpu.pipeline_mode<synchronous>, transform_indices = @transform_6, window_bounds = array<i64: 1, 128>}, {transform_indices = @transform_7, window_bounds = array<i64: 8, 128>}]} {
    %c0 = arith.constant 0 : index
    %c0_0 = arith.constant 0 : index
    %0 = vector.load %arg1[%c0, %c0_0] : memref<8x16xf32, #tpu.memory_space<vmem>>, vector<8x16xf32>
    %c0_1 = arith.constant 0 : index
    %c0_2 = arith.constant 0 : index
    %1 = vector.load %arg2[%c0_1, %c0_2] : memref<128x16xf32, #tpu.memory_space<vmem>>, vector<128x16xf32>
    %c0_3 = arith.constant 0 : index
    %c0_4 = arith.constant 0 : index
    %2 = vector.load %arg3[%c0_3, %c0_4] : memref<1x128xf32, #tpu.memory_space<vmem>>, vector<1x128xf32>
    %cst = arith.constant dense<0.000000e+00> : vector<8x128xf32>
    %3 = tpu.matmul %0, %1, %cst {dimension_numbers = #tpu.dot_dimension_numbers<[1], [1], [0], [0], [0, 0, 1, 0], [], []>} : vector<8x16xf32>, vector<128x16xf32>, vector<8x128xf32> -> vector<8x128xf32>
    %4 = vector.broadcast %2 : vector<1x128xf32> to vector<8x128xf32>
    %5 = arith.addf %3, %4 : vector<8x128xf32>
    %cst_5 = arith.constant 0.000000e+00 : f32
    %6 = vector.broadcast %cst_5 : f32 to vector<8x128xf32>
    %7 = arith.maximumf %5, %6 : vector<8x128xf32>
    %c0_6 = arith.constant 0 : index
    %c0_7 = arith.constant 0 : index
    %8 = vector.load %arg4[%c0_6, %c0_7] : memref<128x128xf32, #tpu.memory_space<vmem>>, vector<128x128xf32>
    %c0_8 = arith.constant 0 : index
    %c0_9 = arith.constant 0 : index
    %9 = vector.load %arg5[%c0_8, %c0_9] : memref<1x128xf32, #tpu.memory_space<vmem>>, vector<1x128xf32>
    %cst_10 = arith.constant dense<0.000000e+00> : vector<8x128xf32>
    %10 = tpu.matmul %7, %8, %cst_10 {dimension_numbers = #tpu.dot_dimension_numbers<[1], [1], [0], [0], [0, 0, 1, 0], [], []>} : vector<8x128xf32>, vector<128x128xf32>, vector<8x128xf32> -> vector<8x128xf32>
    %11 = vector.broadcast %9 : vector<1x128xf32> to vector<8x128xf32>
    %12 = arith.addf %10, %11 : vector<8x128xf32>
    %cst_11 = arith.constant 0.000000e+00 : f32
    %13 = vector.broadcast %cst_11 : f32 to vector<8x128xf32>
    %14 = arith.maximumf %12, %13 : vector<8x128xf32>
    %c0_12 = arith.constant 0 : index
    %c0_13 = arith.constant 0 : index
    %15 = vector.load %arg6[%c0_12, %c0_13] : memref<128x128xf32, #tpu.memory_space<vmem>>, vector<128x128xf32>
    %c0_14 = arith.constant 0 : index
    %c0_15 = arith.constant 0 : index
    %16 = vector.load %arg7[%c0_14, %c0_15] : memref<1x128xf32, #tpu.memory_space<vmem>>, vector<1x128xf32>
    %cst_16 = arith.constant dense<0.000000e+00> : vector<8x128xf32>
    %17 = tpu.matmul %14, %15, %cst_16 {dimension_numbers = #tpu.dot_dimension_numbers<[1], [1], [0], [0], [0, 0, 1, 0], [], []>} : vector<8x128xf32>, vector<128x128xf32>, vector<8x128xf32> -> vector<8x128xf32>
    %18 = vector.broadcast %16 : vector<1x128xf32> to vector<8x128xf32>
    %19 = arith.addf %17, %18 : vector<8x128xf32>
    %20 = arith.negf %19 : vector<8x128xf32>
    %21 = math.exp %20 : vector<8x128xf32>
    %cst_17 = arith.constant 1.000000e+00 : f32
    %22 = vector.broadcast %cst_17 : f32 to vector<8x128xf32>
    %23 = arith.addf %22, %21 : vector<8x128xf32>
    %24 = arith.divf %22, %23 : vector<8x128xf32>
    %c0_18 = arith.constant 0 : index
    %c0_19 = arith.constant 0 : index
    %25 = vector.load %arg8[%c0_18, %c0_19] : memref<8x128xf32, #tpu.memory_space<vmem>>, vector<8x128xf32>
    tpu.vector_store %arg8[%c0_18, %c0_19], %24 {strides = array<i32>} : memref<8x128xf32, #tpu.memory_space<vmem>>, vector<8x128xf32>,
    return
  }
  func.func @transform_0(%arg0: i32) -> (i32, i32) {
    %c0_i32 = arith.constant 0 : i32
    %c0_i32_0 = arith.constant 0 : i32
    return %arg0, %c0_i32 : i32, i32
  }
  func.func @transform_1(%arg0: i32) -> (i32, i32) {
    %c0_i32 = arith.constant 0 : i32
    %c0_i32_0 = arith.constant 0 : i32
    %c0_i32_1 = arith.constant 0 : i32
    return %c0_i32, %c0_i32_0 : i32, i32
  }
  func.func @transform_2(%arg0: i32) -> (i32, i32) {
    %c0_i32 = arith.constant 0 : i32
    %c0_i32_0 = arith.constant 0 : i32
    %c0_i32_1 = arith.constant 0 : i32
    return %c0_i32, %c0_i32_0 : i32, i32
  }
  func.func @transform_3(%arg0: i32) -> (i32, i32) {
    %c0_i32 = arith.constant 0 : i32
    %c0_i32_0 = arith.constant 0 : i32
    %c0_i32_1 = arith.constant 0 : i32
    return %c0_i32, %c0_i32_0 : i32, i32
  }
  func.func @transform_4(%arg0: i32) -> (i32, i32) {
    %c0_i32 = arith.constant 0 : i32
    %c0_i32_0 = arith.constant 0 : i32
    %c0_i32_1 = arith.constant 0 : i32
    return %c0_i32, %c0_i32_0 : i32, i32
  }
  func.func @transform_5(%arg0: i32) -> (i32, i32) {
    %c0_i32 = arith.constant 0 : i32
    %c0_i32_0 = arith.constant 0 : i32
    %c0_i32_1 = arith.constant 0 : i32
    return %c0_i32, %c0_i32_0 : i32, i32
  }
  func.func @transform_6(%arg0: i32) -> (i32, i32) {
    %c0_i32 = arith.constant 0 : i32
    %c0_i32_0 = arith.constant 0 : i32
    %c0_i32_1 = arith.constant 0 : i32
    return %c0_i32, %c0_i32_0 : i32, i32
  }
  func.func @transform_7(%arg0: i32) -> (i32, i32) {
    %c0_i32 = arith.constant 0 : i32
    %c0_i32_0 = arith.constant 0 : i32
    return %arg0, %c0_i32 : i32, i32
  }
}

</mosaic_0001>

<bundles_post_ra>
// kernel: _forward_impl.1
= control target key start
LH: loop header
LB: loop body
LE: loop exit
PB: predicated region body
PF: predicated region fallthrough
CT: control target
= control target key end

     0   :  { %12 = vsyncpa [#allocation3], 0  ;;  %s466_s0 = inlined_call_operand.vmem [shape: f32[8,16], index: 0, kind: input, shape index: {}]   ;;  %s467_s1 = inlined_call_operand.hbm [shape: f32[128,16], index: 1, kind: input, shape index: {}]   ;;  %s468_s2 = inlined_call_operand.vmem [shape: f32[1,128], index: 2, kind: input, shape index: {}]   ;;  %s469_s3 = inlined_call_operand.hbm [shape: f32[128,128], index: 3, kind: input, shape index: {}]   ;;  %s470_s4 = inlined_call_operand.vmem [shape: f32[1,128], index: 4, kind: input, shape index: {}]   ;;  %s471_s5 = inlined_call_operand.hbm [shape: f32[128,128], index: 5, kind: input, shape index: {}]   ;;  %s472_s6 = inlined_call_operand.vmem [shape: f32[1,128], index: 6, kind: input, shape index: {}]   ;;  %s473_s7 = inlined_call_operand.vmem [shape: f32[8,128], index: 7, kind: output, shape index: {}]  }
   0x1   :  { %13 = vsyncpa [#allocation5], 0  ;;  %s35_s26 = sshll.u32 %s469_s3, 4  ;;  %s380_s27 = smov [#allocation4]   ;;  %s36_s26 = int_to_ptr.hbm [resolvable:$true] %s35_s26 }
   0x2   :  { %s37_s28 = sshll.u32 %s380_s27, 4  ;;  %s20_s8 = sshll.u32 %s467_s1, 4  ;;  %s38_s28 = int_to_ptr.vmem [resolvable:$true] %s37_s28  ;;  %s21_s8 = int_to_ptr.hbm [resolvable:$true] %s20_s8 }
   0x3   :  { %s381_s9 = smov 128   ;;  %s382_s10 = smov 8  }
   0x4   :  { %43 = dma.hbm_to_vmem [thread:$0]  %s36_s26, 2048, %s38_s28, [#allocation5], %s381_s9, %s381_s9, %s382_s10  }
   0x5   :  { %s383_s11 = smov [#allocation2]   ;;  %s50_s15 = sshll.u32 %s471_s5, 4  ;;  %s51_s15 = int_to_ptr.hbm [resolvable:$true] %s50_s15 }
   0x6   :  { %s22_s12 = sshll.u32 %s383_s11, 4  ;;  %s384_s3 = smov [#allocation6]   ;;  %s23_s12 = int_to_ptr.vmem [resolvable:$true] %s22_s12 }
   0x7   :  { %28 = dma.hbm_to_vmem [thread:$0]  %s21_s8, 2048, %s23_s12, [#allocation3], %s381_s9, %s381_s9, %s382_s10  }
   0x8   :  { %s52_s16 = sshll.u32 %s384_s3, 4  ;;  %s53_s16 = int_to_ptr.vmem [resolvable:$true] %s52_s16 }
   0x9   :  { %58 = dma.hbm_to_vmem [thread:$0]  %s51_s15, 2048, %s53_s16, [#allocation5], %s381_s9, %s381_s9, %s382_s10  }
   0xa   :  { %376 = dma.done.wait [#allocation3], 2048  }
   0xb   :  { %377 = vsyncadd [#allocation3], 4294965248 }
   0xc   :  { %378 = dma.done.wait [#allocation5], 4096  }
   0xd   :  { %379 = vsyncadd [#allocation5], 4294963200  ;;  %vm94_vm0 = vcmask 130048   ;;  %v89_v0 = vld [vmem:[#allocation2 + $0x78] sm:$0xff]  ;;  %v88_v1 = vld [vmem:[#allocation2 + $0x70] sm:$0xff] }
   0xe   :  { %274 = vmatpush.xpose.msk.msra.mxu0 %vm94_vm0, %v89_v0  ;;  %v87_v2 = vld [vmem:[#allocation2 + $0x68] sm:$0xff]  ;;  %v86_v3 = vld [vmem:[#allocation2 + $0x60] sm:$0xff]  ;;  %v85_v4 = vld [vmem:[#allocation2 + $0x58] sm:$0xff] }
   0xf   :  { %v84_v5 = vld [vmem:[#allocation2 + $0x50] sm:$0xff]  ;;  %v83_v6 = vld [vmem:[#allocation2 + $0x48] sm:$0xff]  ;;  %v82_v7 = vld [vmem:[#allocation2 + $0x40] sm:$0xff] }
  0x10   :  { %v81_v8 = vld [vmem:[#allocation2 + $0x38] sm:$0xff]  ;;  %v80_v10 = vld [vmem:[#allocation2 + $0x30] sm:$0xff]  ;;  %v79_v12 = vld [vmem:[#allocation2 + $0x28] sm:$0xff] }
  0x11   :  { %v182_v9 = vld [vmem:[#allocation4 + $0x78] sm:$0xff]  ;;  %v181_v11 = vld [vmem:[#allocation4 + $0x70] sm:$0xff]  ;;  %v180_v13 = vld [vmem:[#allocation4 + $0x68] sm:$0xff] }
  0x12   :  { %275 = vmatpush.xpose.msk.msra.mxu0 %vm94_vm0, %v88_v1  ;;  %187 = vmatpush.xpose.msra.mxu1 %v182_v9  ;;  %v78_v14 = vld [vmem:[#allocation2 + $0x20] sm:$0xff]  ;;  %v77_v16 = vld [vmem:[#allocation2 + $0x18] sm:$0xff]  ;;  %v76_v18 = vld [vmem:[#allocation2 + $0x10] sm:$0xff] }
  0x13   :  { %v179_v15 = vld [vmem:[#allocation4 + $0x60] sm:$0xff]  ;;  %v178_v17 = vld [vmem:[#allocation4 + $0x58] sm:$0xff]  ;;  %v177_v19 = vld [vmem:[#allocation4 + $0x50] sm:$0xff] }
  0x14   :  { %v75_v20 = vld [vmem:[#allocation2 + $0x8] sm:$0xff]  ;;  %v74_v22 = vld [vmem:[#allocation2] sm:$0xff]  ;;  %v174_v25 = vld [vmem:[#allocation4 + $0x38] sm:$0xff] }
  0x15   :  { %v176_v21 = vld [vmem:[#allocation4 + $0x48] sm:$0xff]  ;;  %v175_v23 = vld [vmem:[#allocation4 + $0x40] sm:$0xff]  ;;  %v173_v26 = vld [vmem:[#allocation4 + $0x30] sm:$0xff] }
  0x16   :  { %276 = vmatpush.xpose.msk.msra.mxu0 %vm94_vm0, %v87_v2  ;;  %188 = vmatpush.xpose.msra.mxu1 %v181_v11  ;;  %v73_v24 = vld [vmem:[%s466_s0] sm:$0xff]  ;;  %v172_v27 = vld [vmem:[#allocation4 + $0x28] sm:$0xff]  ;;  %v170_v29 = vld [vmem:[#allocation4 + $0x18] sm:$0xff] }
  0x17   :  { %v171_v28 = vld [vmem:[#allocation4 + $0x20] sm:$0xff]  ;;  %v169_v30 = vld [vmem:[#allocation4 + $0x10] sm:$0xff]  ;;  %v168_v31 = vld [vmem:[#allocation4 + $0x8] sm:$0xff] }
  0x18   :  { %v167_v32 = vld [vmem:[#allocation4] sm:$0xff]  ;;  %v223_v33 = vld [vmem:[#allocation6 + $0x78] sm:$0xff]  ;;  %v222_v34 = vld [vmem:[#allocation6 + $0x70] sm:$0xff] }
  0x19   :  { %228 = vmatpush.xpose.msra.mxu2 %v223_v33  ;;  %v221_v35 = vld [vmem:[#allocation6 + $0x68] sm:$0xff]  ;;  %v220_v36 = vld [vmem:[#allocation6 + $0x60] sm:$0xff]  ;;  %v219_v37 = vld [vmem:[#allocation6 + $0x58] sm:$0xff] }
  0x1a   :  { %277 = vmatpush.xpose.msk.msra.mxu0 %vm94_vm0, %v86_v3  ;;  %189 = vmatpush.xpose.msra.mxu1 %v180_v13  ;;  %v218_v38 = vld [vmem:[#allocation6 + $0x50] sm:$0xff]  ;;  %v217_v39 = vld [vmem:[#allocation6 + $0x48] sm:$0xff]  ;;  %v297_v40 = vld [vmem:[%s468_s2] ss:$0 sm:$0xff] }
  0x1b   :  { %v216_v41 = vld [vmem:[#allocation6 + $0x40] sm:$0xff]  ;;  %v215_v45 = vld [vmem:[#allocation6 + $0x38] sm:$0xff]  ;;  %v214_v46 = vld [vmem:[#allocation6 + $0x30] sm:$0xff] }
  0x1c   :  { %v213_v47 = vld [vmem:[#allocation6 + $0x28] sm:$0xff]  ;;  %v212_v48 = vld [vmem:[#allocation6 + $0x20] sm:$0xff]  ;;  %v211_v49 = vld [vmem:[#allocation6 + $0x18] sm:$0xff] }
  0x1d   :  { %229 = vmatpush.xpose.msra.mxu2 %v222_v34  ;;  %v210_v50 = vld [vmem:[#allocation6 + $0x10] sm:$0xff]  ;;  %v209_v51 = vld [vmem:[#allocation6 + $0x8] sm:$0xff]  ;;  %v208_v52 = vld [vmem:[#allocation6] sm:$0xff] }
  0x1e   :  { %278 = vmatpush.xpose.msk.msra.mxu0 %vm94_vm0, %v85_v4  ;;  %190 = vmatpush.xpose.msra.mxu1 %v179_v15  ;;  %v298_v53 = vld [vmem:[%s470_s4] ss:$0 sm:$0xff] }
  0x1f   :  { %v299_v57 = vld [vmem:[%s472_s6] ss:$0 sm:$0xff] }
  0x21   :  { %230 = vmatpush.xpose.msra.mxu2 %v221_v35 }
  0x22   :  { %279 = vmatpush.xpose.msk.msra.mxu0 %vm94_vm0, %v84_v5  ;;  %191 = vmatpush.xpose.msra.mxu1 %v178_v17 }
  0x25   :  { %231 = vmatpush.xpose.msra.mxu2 %v220_v36 }
  0x26   :  { %280 = vmatpush.xpose.msk.msra.mxu0 %vm94_vm0, %v83_v6  ;;  %192 = vmatpush.xpose.msra.mxu1 %v177_v19 }
  0x29   :  { %232 = vmatpush.xpose.msra.mxu2 %v219_v37 }
  0x2a   :  { %281 = vmatpush.xpose.msk.msra.mxu0 %vm94_vm0, %v82_v7  ;;  %193 = vmatpush.xpose.msra.mxu1 %v176_v21 }
  0x2d   :  { %233 = vmatpush.xpose.msra.mxu2 %v218_v38 }
  0x2e   :  { %282 = vmatpush.xpose.msk.msra.mxu0 %vm94_vm0, %v81_v8  ;;  %194 = vmatpush.xpose.msra.mxu1 %v175_v23 }
  0x31   :  { %234 = vmatpush.xpose.msra.mxu2 %v217_v39 }
  0x32   :  { %283 = vmatpush.xpose.msk.msra.mxu0 %vm94_vm0, %v80_v10  ;;  %195 = vmatpush.xpose.msra.mxu1 %v174_v25 }
  0x35   :  { %235 = vmatpush.xpose.msra.mxu2 %v216_v41 }
  0x36   :  { %284 = vmatpush.xpose.msk.msra.mxu0 %vm94_vm0, %v79_v12  ;;  %196 = vmatpush.xpose.msra.mxu1 %v173_v26 }
  0x39   :  { %236 = vmatpush.xpose.msra.mxu2 %v215_v45 }
  0x3a   :  { %285 = vmatpush.xpose.msk.msra.mxu0 %vm94_vm0, %v78_v14  ;;  %197 = vmatpush.xpose.msra.mxu1 %v172_v27 }
  0x3d   :  { %237 = vmatpush.xpose.msra.mxu2 %v214_v46 }
  0x3e   :  { %286 = vmatpush.xpose.msk.msra.mxu0 %vm94_vm0, %v77_v16  ;;  %198 = vmatpush.xpose.msra.mxu1 %v171_v28 }
  0x41   :  { %238 = vmatpush.xpose.msra.mxu2 %v213_v47 }
  0x42   :  { %287 = vmatpush.xpose.msk.msra.mxu0 %vm94_vm0, %v76_v18  ;;  %199 = vmatpush.xpose.msra.mxu1 %v170_v29 }
  0x45   :  { %239 = vmatpush.xpose.msra.mxu2 %v212_v48 }
  0x46   :  { %288 = vmatpush.xpose.msk.msra.mxu0 %vm94_vm0, %v75_v20  ;;  %200 = vmatpush.xpose.msra.mxu1 %v169_v30 }
  0x49   :  { %240 = vmatpush.xpose.msra.mxu2 %v211_v49 }
  0x4a   :  { %289 = vmatpush.xpose.msk.msra.mxu0 %vm94_vm0, %v74_v22  ;;  %201 = vmatpush.xpose.msra.mxu1 %v168_v31 }
  0x4d   :  { %290 = vmatmul.msk.f32.vlgmr.msra.gmra.mxu0 %vm94_vm0, %v73_v24  ;;  %241 = vmatpush.xpose.msra.mxu2 %v210_v50 }
  0x4e   :  { %202 = vmatpush.xpose.msra.mxu1 %v167_v32 }
  0x51   :  { %242 = vmatpush.xpose.msra.mxu2 %v209_v51 }
  0x55   :  { %243 = vmatpush.xpose.msra.mxu2 %v208_v52 }
  0xca   :  { %v163_v42 = vpop.f32.mrf.mxu0 }
  0xcb   :  { %v164_v43 = vadd.f32 %v297_v40, %v163_v42 }
  0xcd   :  { %v166_v44 = vmax.f32 %v164_v43, 0.0 }
  0xcf   :  { %203 = vmatmul.f32.vlgmr.msra.gmra.mxu1 %v166_v44 }
 0x14c   :  { %v204_v54 = vpop.f32.mrf.mxu1 }
 0x14d   :  { %v205_v55 = vadd.f32 %v298_v53, %v204_v54 }
 0x14f   :  { %v207_v56 = vmax.f32 %v205_v55, 0.0 }
 0x151   :  { %244 = vmatmul.f32.vlgmr.msra.gmra.mxu2 %v207_v56 }
 0x1d4   :  { %v245_v58 = vpop.f32.mrf.mxu2 }
 0x1d5   :  { %v246_v59 = vadd.f32 %v299_v57, %v245_v58 }
 0x1d7   :  { %v291_v60 = vmul.f32 -1.442695, %v246_v59 }
 0x1d9   :  { %300 = vpow2.f32 %v291_v60 }
 0x1df   :  { %v301_v61 = vpop.eup %300 }
 0x1e0   :  { %v251_v62 = vadd.f32 1.0, %v301_v61 }
 0x1e2   :  { %302 = vrcp.f32 %v251_v62  ;;  %v263_v2 = vand.u32 2147483648, %v251_v62  ;;  %v261_v4 = vand.u32 2147483647, %v251_v62  ;;  %vm257_vm2 = vweird.f32 %v251_v62 }
 0x1e4   :  { %v264_v6 = vor.u32 1.1754944e-38, %v263_v2  ;;  %vm262_vm4 = vcmp.eq.f32.partialorder %v261_v4, 8.507059e+37 }
 0x1e8   :  { %v303_v63 = vpop.eup %302 }
 0x1e9   :  { %v253_v0 = vmul.f32 %v303_v63, %v251_v62  ;;  %vm258_vm1 = vweird.f32 %v303_v63 }
 0x1ea   :  { %vm259_vm3 = vmor %vm257_vm2, %vm258_vm1 }
 0x1eb   :  { %v254_v1 = vsub.f32 1.0, %v253_v0 }
 0x1ed   :  { %v255_v3 = vmul.f32 %v303_v63, %v254_v1 }
 0x1ef   :  { %v256_v5 = vadd.f32 %v303_v63, %v255_v3 }
 0x1f1   :  { %v260_v7 = vsel %vm259_vm3, %v303_v63, %v256_v5 }
 0x1f2   :  { %v265_v8 = vsel %vm262_vm4, %v264_v6, %v260_v7 }
 0x1f3   :  { %267 = vst [vmem:[%s473_s7] sm:$0xff] %v265_v8 }
 0x1f4   :  { %272 = vsyncpa [#allocation3], 1 }
 0x1f5   :  { %273 = vsyncpa [#allocation5], 1 }

</bundles_post_ra>
